<compile_context>
chip_gen: v6e
topology: v6e:2x2x1
jax: 0.10.0
libtpu: 0.0.40
codegen_flags: <defaults>
</compile_context>

<pallas_src>
import math
from functools import partial

import jax
import jax.numpy as jnp
from jax.experimental import pallas as pl
from jax.experimental.pallas import tpu as pltpu


# ----------------------------------------------------------------------------
# Kernel
# ----------------------------------------------------------------------------
def merge_layer_kernel(x1_ref, x2_ref, w1a_ref, w1b_ref, b1_ref,
                       w2_ref, b2_ref, o_ref):
    # fc1 as two MXU dots accumulating in f32 (no in-kernel concat).
    h = jnp.dot(x1_ref[...].astype(w1a_ref.dtype), w1a_ref[...],
                preferred_element_type=jnp.float32)
    h = h + jnp.dot(x2_ref[...].astype(w1b_ref.dtype), w1b_ref[...],
                    preferred_element_type=jnp.float32)
    # bias + ReLU on the VPU (biases kept in f32).
    h = jnp.maximum(h + b1_ref[...], 0.0)
    # fc2: cast h to the weight dtype so bf16 weights hit the bf16 MXU rate.
    out = jnp.dot(h.astype(w2_ref.dtype), w2_ref[...],
                  preferred_element_type=jnp.float32) + b2_ref[...]
    o_ref[...] = out.astype(o_ref.dtype)


# ----------------------------------------------------------------------------
# Helpers
# ----------------------------------------------------------------------------
def _round_up(x, m):
    return ((x + m - 1) // m) * m


def _vmem_limit_bytes():
    """Per-generation scoped-VMEM limit (~96 MiB v5e/v6e, ~48 MiB v7x per TC)."""
    try:
        cap = pltpu.get_tpu_info().vmem_capacity_bytes
    except Exception:
        cap = 64 * 1024 * 1024  # conservative: v7x per-TC physical VMEM
    return int(cap * 0.75)


def prepare_params(w1, b1, w2, b2, dim1, *, compute_dtype=jnp.bfloat16):
    """One-time parameter prep (hoisted out of the per-call path).

    w1: [dim3, dim1+dim2], b1: [dim3]   (PyTorch Linear convention)
    w2: [dim4, dim3],      b2: [dim4]

    Splits W1 by input (x1 vs x2), transposes to [in, out], zero-pads the
    hidden dim d3 to a multiple of 128 (VMEM-only, exact: relu(0)=0 and zero
    W2 rows), and casts weights to compute_dtype (biases stay f32).
    """
    d3, din = w1.shape
    d4, d3_ = w2.shape
    assert d3_ == d3
    d2 = din - dim1
    assert d2 > 0

    d3p = _round_up(d3, 128)

    w1a_t = jnp.pad(w1[:, :dim1].T, ((0, 0), (0, d3p - d3)))   # [d1, d3p]
    w1b_t = jnp.pad(w1[:, dim1:].T, ((0, 0), (0, d3p - d3)))   # [d2, d3p]
    b1p = jnp.pad(b1, (0, d3p - d3)).reshape(1, d3p).astype(jnp.float32)
    w2_t = jnp.pad(w2.T, ((0, d3p - d3), (0, 0)))               # [d3p, d4]
    b2p = b2.reshape(1, d4).astype(jnp.float32)

    if compute_dtype is not None:
        w1a_t = w1a_t.astype(compute_dtype)
        w1b_t = w1b_t.astype(compute_dtype)
        w2_t = w2_t.astype(compute_dtype)

    return dict(w1a_t=w1a_t, w1b_t=w1b_t, b1=b1p, w2_t=w2_t, b2=b2p)


def _choose_block_m(B, d_in, d3p, d4, act_itemsize, w_itemsize, out_itemsize,
                    vmem_budget):
    """Batch tile from the per-generation VMEM budget, 8-aligned."""
    # Resident weights/biases are single-buffered (pl.Buffered(1)).
    weight_bytes = (d_in * d3p + d3p * d4) * w_itemsize + (d3p + d4) * 4
    avail = vmem_budget - weight_bytes
    if avail <= 0:
        # TODO(synk): when weights don't fit VMEM (huge d3/d4), add grid axes
        # over d4 / d3p (reduction axis last, f32 accumulator scratch) instead
        # of collapsing block_m.
        avail = 4 * 1024 * 1024
    # Per batch row: double-buffered x1/x2/out tiles + f32 intermediates (h, out).
    per_row = 2 * (d_in * act_itemsize + d4 * out_itemsize) + (d3p + d4) * 4
    bm = max(min(avail // per_row, 1024), 8)
    bm = min(bm, _round_up(B, 8))
    bm = max(8, (bm // 8) * 8)

    steps = pl.cdiv(B, bm)
    if B >= 256 and steps < 2:
        steps = 2                  # keep the DMA/compute pipeline overlapped
    if steps > 1 and steps % 2 == 1:
        steps += 1                 # even step count balances v7x's 2 TensorCores
    bm = min(_round_up(pl.cdiv(B, steps), 8), _round_up(B, 8))
    return max(8, bm)


# ----------------------------------------------------------------------------
# Forward pass
# ----------------------------------------------------------------------------
def merge_layer_apply(x1, x2, params, *, block_m=None, out_dtype=None,
                      io_buffer_count=None):
    """x1: [B, dim1], x2: [B, dim2]; params from prepare_params()."""
    w1a_t, w1b_t, b1p = params["w1a_t"], params["w1b_t"], params["b1"]
    w2_t, b2p = params["w2_t"], params["b2"]

    B, d1 = x1.shape
    B2, d2 = x2.shape
    assert B2 == B
    assert w1a_t.shape[0] == d1 and w1b_t.shape[0] == d2
    d3p = w1a_t.shape[1]
    d4 = w2_t.shape[1]
    d_in = d1 + d2
    out_dtype = out_dtype or x1.dtype

    vmem_limit = _vmem_limit_bytes()
    if block_m is None:
        block_m = _choose_block_m(
            B, d_in, d3p, d4,
            act_itemsize=jnp.dtype(x1.dtype).itemsize,
            w_itemsize=jnp.dtype(w1a_t.dtype).itemsize,
            out_itemsize=jnp.dtype(out_dtype).itemsize,
            vmem_budget=int(vmem_limit * 0.9))
    block_m = max(8, (block_m // 8) * 8)   # sublane-aligned

    # No batch padding: Pallas masks the partial last block.
    grid = (pl.cdiv(B, block_m),)

    # Streamed tiles: default double-buffering unless overridden (e.g. 3 on
    # v5e if profiling shows exposed DMA with short per-step compute).
    io_kwargs = {}
    if io_buffer_count is not None:
        io_kwargs["pipeline_mode"] = pl.Buffered(io_buffer_count)
    # Resident weights/biases: constant index map -> single VMEM buffer.
    res_kwargs = dict(pipeline_mode=pl.Buffered(1))

    flops = 2 * B * (d_in * d3p + d3p * d4)
    bytes_accessed = (
        B * d_in * jnp.dtype(x1.dtype).itemsize
        + B * d4 * jnp.dtype(out_dtype).itemsize
        + (d_in * d3p + d3p * d4) * jnp.dtype(w1a_t.dtype).itemsize
        + (d3p + d4) * 4)

    out = pl.pallas_call(
        merge_layer_kernel,
        out_shape=jax.ShapeDtypeStruct((B, d4), out_dtype),
        grid_spec=pltpu.PrefetchScalarGridSpec(
            num_scalar_prefetch=0,
            grid=grid,
            in_specs=[
                pl.BlockSpec((block_m, d1), lambda i: (i, 0), **io_kwargs),  # x1
                pl.BlockSpec((block_m, d2), lambda i: (i, 0), **io_kwargs),  # x2
                pl.BlockSpec((d1, d3p), lambda i: (0, 0), **res_kwargs),     # W1a^T
                pl.BlockSpec((d2, d3p), lambda i: (0, 0), **res_kwargs),     # W1b^T
                pl.BlockSpec((1, d3p), lambda i: (0, 0), **res_kwargs),      # b1
                pl.BlockSpec((d3p, d4), lambda i: (0, 0), **res_kwargs),     # W2^T
                pl.BlockSpec((1, d4), lambda i: (0, 0), **res_kwargs),       # b2
            ],
            out_specs=pl.BlockSpec((block_m, d4), lambda i: (i, 0), **io_kwargs),
        ),
        compiler_params=pltpu.CompilerParams(
            dimension_semantics=("parallel",),
            vmem_limit_bytes=vmem_limit),
        cost_estimate=pl.CostEstimate(flops=flops, transcendentals=0,
                                      bytes_accessed=bytes_accessed),
    )(x1, x2, w1a_t, w1b_t, b1p, w2_t, b2p)

    return out  # already (B, d4): no padding to strip


def merge_layer(x1, x2, w1, b1, w2, b2, *, block_m=None,
                compute_dtype=jnp.bfloat16):
    """Convenience one-shot API (prefer prepare_params + merge_layer_apply
    for repeated calls so transposes / padding / casts happen once)."""
    params = prepare_params(w1, b1, w2, b2, x1.shape[1],
                            compute_dtype=compute_dtype)
    return merge_layer_apply(x1, x2, params, block_m=block_m)


# ----------------------------------------------------------------------------
# Deterministic init matching the PyTorch module
# ----------------------------------------------------------------------------
def init_params(key, dim1, dim2, dim3, dim4, dtype=jnp.float32):
    """Weights: xavier_normal_. Biases: PyTorch Linear default U(+-1/sqrt(fan_in))."""
    k1, k2, k3, k4 = jax.random.split(key, 4)
    fan_in1, fan_out1 = dim1 + dim2, dim3
    fan_in2, fan_out2 = dim3, dim4
    std1 = math.sqrt(2.0 / (fan_in1 + fan_out1))
    std2 = math.sqrt(2.0 / (fan_in2 + fan_out2))
    w1 = std1 * jax.random.normal(k1, (dim3, dim1 + dim2), dtype)
    w2 = std2 * jax.random.normal(k2, (dim4, dim3), dtype)
    bb1 = 1.0 / math.sqrt(fan_in1)
    bb2 = 1.0 / math.sqrt(fan_in2)
    b1 = jax.random.uniform(k3, (dim3,), dtype, minval=-bb1, maxval=bb1)
    b2 = jax.random.uniform(k4, (dim4,), dtype, minval=-bb2, maxval=bb2)
    return w1, b1, w2, b2


if __name__ == "__main__":
    key = jax.random.PRNGKey(0)
    kx1, kx2, kp = jax.random.split(key, 3)

    # Small shapes consistent with MergeLayer(dim1, dim2, dim3, dim4)
    batch, dim1, dim2, dim3, dim4 = 8, 16, 16, 32, 8

    x1 = jax.random.normal(kx1, (batch, dim1), jnp.float32)
    x2 = jax.random.normal(kx2, (batch, dim2), jnp.float32)
    w1, b1, w2, b2 = init_params(kp, dim1, dim2, dim3, dim4)

    # One-time param prep (transpose / split / pad / bf16 cast hoisted out).
    params = prepare_params(w1, b1, w2, b2, dim1)  # bf16 weights by default
    fwd = jax.jit(partial(merge_layer_apply, params=params))

    out = fwd(x1, x2)
    jax.block_until_ready(out)
    assert out.shape == (batch, dim4)

    # References.
    x = jnp.concatenate([x1, x2], axis=1)
    ref_f32 = jnp.maximum(x @ w1.T + b1, 0.0) @ w2.T + b2
    # bf16-weight reference matching the kernel's compute dtype (f32 accumulation).
    h = jnp.maximum(
        jnp.dot(x.astype(jnp.bfloat16), w1.T.astype(jnp.bfloat16),
                preferred_element_type=jnp.float32) + b1, 0.0)
    ref_bf16 = jnp.dot(h.astype(jnp.bfloat16), w2.T.astype(jnp.bfloat16),
                       preferred_element_type=jnp.float32) + b2

    out_f32 = out.astype(jnp.float32)
    assert jnp.allclose(out_f32, ref_bf16, atol=1e-3, rtol=1e-3), (
        "max |diff| vs bf16 ref = %f"
        % float(jnp.max(jnp.abs(out_f32 - ref_bf16))))
    assert jnp.allclose(out_f32, ref_f32, atol=1e-1, rtol=1e-1)

    print("KERNEL_OK")
</pallas_src>

<mosaic_0001>
module attributes {stable_mosaic.version = 11 : i64} {
  func.func @merge_layer_kernel(%arg0: i32, %arg1: memref<8x16xf32, #tpu.memory_space<vmem>>, %arg2: memref<8x16xf32, #tpu.memory_space<vmem>>, %arg3: memref<16x128xbf16, #tpu.memory_space<vmem>>, %arg4: memref<16x128xbf16, #tpu.memory_space<vmem>>, %arg5: memref<1x128xf32, #tpu.memory_space<vmem>>, %arg6: memref<128x8xbf16, #tpu.memory_space<vmem>>, %arg7: memref<1x8xf32, #tpu.memory_space<vmem>>, %arg8: memref<8x8xf32, #tpu.memory_space<vmem>>) attributes {dimension_semantics = [#tpu.dimension_semantics<parallel>], iteration_bounds = array<i64: 1>, scalar_prefetch = 0 : i64, scratch_operands = 0 : i64, tpu.core_type = #tpu.core_type<tc>, window_params = [{transform_indices = @transform_0, window_bounds = array<i64: 8, 16>}, {transform_indices = @transform_1, window_bounds = array<i64: 8, 16>}, {pipeline_mode = #tpu.pipeline_mode<synchronous>, transform_indices = @transform_2, window_bounds = array<i64: 16, 128>}, {pipeline_mode = #tpu.pipeline_mode<synchronous>, transform_indices = @transform_3, window_bounds = array<i64: 16, 128>}, {pipeline_mode = #tpu.pipeline_mode<synchronous>, transform_indices = @transform_4, window_bounds = array<i64: 1, 128>}, {pipeline_mode = #tpu.pipeline_mode<synchronous>, transform_indices = @transform_5, window_bounds = array<i64: 128, 8>}, {pipeline_mode = #tpu.pipeline_mode<synchronous>, transform_indices = @transform_6, window_bounds = array<i64: 1, 8>}, {transform_indices = @transform_7, window_bounds = array<i64: 8, 8>}]} {
    %c0 = arith.constant 0 : index
    %c0_0 = arith.constant 0 : index
    %0 = vector.load %arg1[%c0, %c0_0] : memref<8x16xf32, #tpu.memory_space<vmem>>, vector<8x16xf32>
    %1 = arith.truncf %0 : vector<8x16xf32> to vector<8x16xbf16>
    %c0_1 = arith.constant 0 : index
    %c0_2 = arith.constant 0 : index
    %2 = vector.load %arg3[%c0_1, %c0_2] : memref<16x128xbf16, #tpu.memory_space<vmem>>, vector<16x128xbf16>
    %cst = arith.constant dense<0.000000e+00> : vector<8x128xf32>
    %3 = tpu.matmul %1, %2, %cst {dimension_numbers = #tpu.dot_dimension_numbers<[1], [0], [0], [1], [0, 0, 1, 1], [], []>} : vector<8x16xbf16>, vector<16x128xbf16>, vector<8x128xf32> -> vector<8x128xf32>
    %c0_3 = arith.constant 0 : index
    %c0_4 = arith.constant 0 : index
    %4 = vector.load %arg2[%c0_3, %c0_4] : memref<8x16xf32, #tpu.memory_space<vmem>>, vector<8x16xf32>
    %5 = arith.truncf %4 : vector<8x16xf32> to vector<8x16xbf16>
    %c0_5 = arith.constant 0 : index
    %c0_6 = arith.constant 0 : index
    %6 = vector.load %arg4[%c0_5, %c0_6] : memref<16x128xbf16, #tpu.memory_space<vmem>>, vector<16x128xbf16>
    %cst_7 = arith.constant dense<0.000000e+00> : vector<8x128xf32>
    %7 = tpu.matmul %5, %6, %cst_7 {dimension_numbers = #tpu.dot_dimension_numbers<[1], [0], [0], [1], [0, 0, 1, 1], [], []>} : vector<8x16xbf16>, vector<16x128xbf16>, vector<8x128xf32> -> vector<8x128xf32>
    %8 = arith.addf %3, %7 : vector<8x128xf32>
    %c0_8 = arith.constant 0 : index
    %c0_9 = arith.constant 0 : index
    %9 = vector.load %arg5[%c0_8, %c0_9] : memref<1x128xf32, #tpu.memory_space<vmem>>, vector<1x128xf32>
    %10 = vector.broadcast %9 : vector<1x128xf32> to vector<8x128xf32>
    %11 = arith.addf %8, %10 : vector<8x128xf32>
    %cst_10 = arith.constant 0.000000e+00 : f32
    %12 = vector.broadcast %cst_10 : f32 to vector<8x128xf32>
    %13 = arith.maximumf %11, %12 : vector<8x128xf32>
    %14 = arith.truncf %13 : vector<8x128xf32> to vector<8x128xbf16>
    %c0_11 = arith.constant 0 : index
    %c0_12 = arith.constant 0 : index
    %15 = vector.load %arg6[%c0_11, %c0_12] : memref<128x8xbf16, #tpu.memory_space<vmem>>, vector<128x8xbf16>
    %cst_13 = arith.constant dense<0.000000e+00> : vector<8x8xf32>
    %16 = tpu.matmul %14, %15, %cst_13 {dimension_numbers = #tpu.dot_dimension_numbers<[1], [0], [0], [1], [0, 0, 1, 1], [], []>} : vector<8x128xbf16>, vector<128x8xbf16>, vector<8x8xf32> -> vector<8x8xf32>
    %c0_14 = arith.constant 0 : index
    %c0_15 = arith.constant 0 : index
    %17 = vector.load %arg7[%c0_14, %c0_15] : memref<1x8xf32, #tpu.memory_space<vmem>>, vector<1x8xf32>
    %18 = vector.broadcast %17 : vector<1x8xf32> to vector<8x8xf32>
    %19 = arith.addf %16, %18 : vector<8x8xf32>
    %c0_16 = arith.constant 0 : index
    %c0_17 = arith.constant 0 : index
    %20 = vector.load %arg8[%c0_16, %c0_17] : memref<8x8xf32, #tpu.memory_space<vmem>>, vector<8x8xf32>
    tpu.vector_store %arg8[%c0_16, %c0_17], %19 {strides = array<i32>} : memref<8x8xf32, #tpu.memory_space<vmem>>, vector<8x8xf32>,
    return
  }
  func.func @transform_0(%arg0: i32) -> (i32, i32) {
    %c0_i32 = arith.constant 0 : i32
    %c0_i32_0 = arith.constant 0 : i32
    return %arg0, %c0_i32 : i32, i32
  }
  func.func @transform_1(%arg0: i32) -> (i32, i32) {
    %c0_i32 = arith.constant 0 : i32
    %c0_i32_0 = arith.constant 0 : i32
    return %arg0, %c0_i32 : i32, i32
  }
  func.func @transform_2(%arg0: i32) -> (i32, i32) {
    %c0_i32 = arith.constant 0 : i32
    %c0_i32_0 = arith.constant 0 : i32
    %c0_i32_1 = arith.constant 0 : i32
    return %c0_i32, %c0_i32_0 : i32, i32
  }
  func.func @transform_3(%arg0: i32) -> (i32, i32) {
    %c0_i32 = arith.constant 0 : i32
    %c0_i32_0 = arith.constant 0 : i32
    %c0_i32_1 = arith.constant 0 : i32
    return %c0_i32, %c0_i32_0 : i32, i32
  }
  func.func @transform_4(%arg0: i32) -> (i32, i32) {
    %c0_i32 = arith.constant 0 : i32
    %c0_i32_0 = arith.constant 0 : i32
    %c0_i32_1 = arith.constant 0 : i32
    return %c0_i32, %c0_i32_0 : i32, i32
  }
  func.func @transform_5(%arg0: i32) -> (i32, i32) {
    %c0_i32 = arith.constant 0 : i32
    %c0_i32_0 = arith.constant 0 : i32
    %c0_i32_1 = arith.constant 0 : i32
    return %c0_i32, %c0_i32_0 : i32, i32
  }
  func.func @transform_6(%arg0: i32) -> (i32, i32) {
    %c0_i32 = arith.constant 0 : i32
    %c0_i32_0 = arith.constant 0 : i32
    %c0_i32_1 = arith.constant 0 : i32
    return %c0_i32, %c0_i32_0 : i32, i32
  }
  func.func @transform_7(%arg0: i32) -> (i32, i32) {
    %c0_i32 = arith.constant 0 : i32
    %c0_i32_0 = arith.constant 0 : i32
    return %arg0, %c0_i32 : i32, i32
  }
}

</mosaic_0001>

<bundles_post_ra>
// kernel: merge_layer_apply.1
= control target key start
LH: loop header
LB: loop body
LE: loop exit
PB: predicated region body
PF: predicated region fallthrough
CT: control target
= control target key end

     0   :  { %12 = vsyncpa [#allocation3], 0  ;;  %s632_s0 = inlined_call_operand.hbm [shape: f32[8,16], index: 0, kind: input, shape index: {}]   ;;  %s633_s1 = inlined_call_operand.hbm [shape: f32[8,16], index: 1, kind: input, shape index: {}]   ;;  %s634_s2 = inlined_call_operand.hbm [shape: bf16[16,128], index: 2, kind: input, shape index: {}]   ;;  %s635_s3 = inlined_call_operand.hbm [shape: bf16[16,128], index: 3, kind: input, shape index: {}]   ;;  %s636_s4 = inlined_call_operand.vmem [shape: f32[1,128], index: 4, kind: input, shape index: {}]   ;;  %s637_s5 = inlined_call_operand.hbm [shape: bf16[128,8], index: 5, kind: input, shape index: {}]   ;;  %s638_s6 = inlined_call_operand.vmem [shape: f32[1,8], index: 6, kind: input, shape index: {}]   ;;  %s639_s7 = inlined_call_operand.hbm [shape: f32[8,8], index: 7, kind: output, shape index: {}]  }
   0x1   :  { %13 = vsyncpa [#allocation6], 0 }
   0x2   :  { %14 = vsyncpa [#allocation9], 0 }
   0x3   :  { %15 = vsyncpa [#allocation4], 0  ;;  %s546_s24 = smov [#allocation5]  }
   0x4   :  { %s32_s25 = sshll.u32 %s546_s24, 4  ;;  %s33_s25 = int_to_ptr.vmem [resolvable:$true] %s32_s25 }
   0x5   :  { %s426_s26 = scalar_lea.vmem %s33_s25, 128  ;;  %p431_p1 = scmp.lt.s32.totalorder %s33_s25, %s33_s25 }
   0x6   :  { %p427_p0 = scmp.ne.s32.totalorder %s33_s25, %s426_s26  ;;  %p432_p2 = scmp.lt.s32.totalorder %s426_s26, %s426_s26 }
   0x8   :  { %p433_p3 = por %p432_p2, %p431_p1 }
   0xa   :  { %p434_p4 = pnand %p433_p3, %p427_p0 }
   0xc   :  { %437 = shalt.err (!%p434_p4)
}
   0xd   :  { %35 = dma.hbm_to_vmem [thread:$0]  %s633_s1, 128, %s33_s25, [#allocation6]  }
   0xe   :  { %s547_s29 = smov [#allocation8]   ;;  %s548_s8 = smov [#allocation2]  }
   0xf   :  { %s53_s30 = sshll.u32 %s547_s29, 4  ;;  %s22_s9 = sshll.u32 %s548_s8, 4  ;;  %s54_s30 = int_to_ptr.vmem [resolvable:$true] %s53_s30  ;;  %s23_s9 = int_to_ptr.vmem [resolvable:$true] %s22_s9 }
  0x10   :  { %s446_s10 = scalar_lea.vmem %s54_s30, 128  ;;  %p451_p6 = scmp.lt.s32.totalorder %s54_s30, %s54_s30 }
  0x11   :  { %p447_p5 = scmp.ne.s32.totalorder %s54_s30, %s446_s10  ;;  %p452_p7 = scmp.lt.s32.totalorder %s446_s10, %s446_s10 }
  0x13   :  { %p453_p8 = por %p452_p7, %p451_p6 }
  0x15   :  { %p454_p9 = pnand %p453_p8, %p447_p5 }
  0x17   :  { %457 = shalt.err (!%p454_p9)
}
  0x18   :  { %s549_s11 = smov 64   ;;  %s550_s12 = smov 4  }
  0x19   :  { %59 = dma.hbm_to_vmem [thread:$0]  %s635_s3, 128, %s54_s30, [#allocation9], %s549_s11, %s549_s11, %s550_s12  }
  0x1a   :  { %s466_s1 = scalar_lea.vmem %s23_s9, 128  ;;  %p471_p11 = scmp.lt.s32.totalorder %s23_s9, %s23_s9 }
  0x1b   :  { %p467_p10 = scmp.ne.s32.totalorder %s23_s9, %s466_s1  ;;  %p472_p12 = scmp.lt.s32.totalorder %s466_s1, %s466_s1 }
  0x1d   :  { %p473_p13 = por %p472_p12, %p471_p11 }
  0x1f   :  { %p474_p0 = pnand %p473_p13, %p467_p10 }
  0x21   :  { %477 = shalt.err (!%p474_p0)
}
  0x22   :  { %25 = dma.hbm_to_vmem [thread:$0]  %s632_s0, 128, %s23_s9, [#allocation3]  }
  0x23   :  { %s551_s17 = smov [#allocation7]   ;;  %s552_s19 = smov [#allocation10]  }
  0x24   :  { %s41_s18 = sshll.u32 %s551_s17, 4  ;;  %s67_s20 = sshll.u32 %s552_s19, 4  ;;  %s42_s18 = int_to_ptr.vmem [resolvable:$true] %s41_s18  ;;  %s68_s20 = int_to_ptr.vmem [resolvable:$true] %s67_s20 }
  0x25   :  { %s486_s21 = scalar_lea.vmem %s42_s18, 128  ;;  %p491_p2 = scmp.lt.s32.totalorder %s42_s18, %s42_s18 }
  0x26   :  { %p487_p1 = scmp.ne.s32.totalorder %s42_s18, %s486_s21  ;;  %p492_p3 = scmp.lt.s32.totalorder %s486_s21, %s486_s21 }
  0x28   :  { %p493_p4 = por %p492_p3, %p491_p2 }
  0x2a   :  { %p494_p5 = pnand %p493_p4, %p487_p1 }
  0x2c   :  { %497 = shalt.err (!%p494_p5)
}
  0x2d   :  { %47 = dma.hbm_to_vmem [thread:$0]  %s634_s2, 128, %s42_s18, [#allocation6], %s549_s11, %s549_s11, %s550_s12  }
  0x2e   :  { %s506_s0 = scalar_lea.vmem %s68_s20, 1024  ;;  %p511_p7 = scmp.lt.s32.totalorder %s68_s20, %s68_s20 }
  0x2f   :  { %p507_p6 = scmp.ne.s32.totalorder %s68_s20, %s506_s0  ;;  %p512_p8 = scmp.lt.s32.totalorder %s506_s0, %s506_s0 }
  0x31   :  { %p513_p9 = por %p512_p8, %p511_p7 }
  0x33   :  { %p514_p10 = pnand %p513_p9, %p507_p6 }
  0x35   :  { %517 = shalt.err (!%p514_p10)
}
  0x36   :  { %73 = dma.hbm_to_vmem [thread:$0]  %s637_s5, 1024, %s68_s20, [#allocation9], %s549_s11, %s549_s11, %s550_s12  }
  0x37   :  { %538 = dma.done.wait [#allocation3], 128  }
  0x38   :  { %539 = vsyncadd [#allocation3], 4294967168 }
  0x39   :  { %540 = dma.done.wait [#allocation6], 256  }
  0x3a   :  { %541 = vsyncadd [#allocation6], 4294967040 }
  0x3b   :  { %542 = dma.done.wait [#allocation9], 1152  }
  0x3c   :  { %543 = vsyncadd [#allocation9], 4294966144  ;;  %v553_v0 = vmov 0.0   ;;  %vm554_vm0 = vmmov 0   ;;  %v408_v1 = vld [vmem:[#allocation8] sm:$0xff]   ;;  %v96_v2 = vld [vmem:[#allocation5] sm:$0xff] }
  0x3d   :  { %366 = vmatprep.subr.bf16.mxu1 %v553_v0  ;;  %368 = vmatprep.mubr.msk.bf16.mxu1 %vm554_vm0, %v553_v0  ;;  %v97_v3 = vpack.c.bf16 %v96_v2, %v96_v2  ;;  %vm106_vm1 = vcmask 130048   ;;  %v409_v4 = vld [vmem:[#allocation7] sm:$0xff]   ;;  %v410_v5 = vld [vmem:[#allocation10 + $0x38] sm:$0xff]   ;;  %v92_v7 = vld [vmem:[#allocation2] sm:$0xff]  ;;  %s555_s27 = smov [#allocation11]   ;;  %vm320_vm2 = vcmask 64512  }
  0x3e   :  { %378 = vmatprep.subr.bf16.mxu0 %v553_v0  ;;  %394 = vmatprep.mubr.msk.bf16.mxu0 %vm554_vm0, %v553_v0  ;;  %v411_v6 = vld [vmem:[#allocation10 + $0x30] sm:$0xff]   ;;  %v93_v8 = vpack.c.bf16 %v92_v7, %v92_v7  ;;  %v412_v9 = vld [vmem:[#allocation10 + $0x28] sm:$0xff]   ;;  %v413_v10 = vld [vmem:[#allocation10 + $0x20] sm:$0xff]   ;;  %s328_s28 = sshll.u32 %s555_s27, 4  ;;  %s329_s28 = int_to_ptr.vmem [resolvable:$true] %s328_s28 }
  0x3f   :  { %367 = vmatpush3.bf16.msra.mxu1 %v408_v1  ;;  %379 = vmatpush3.bf16.msra.mxu0 %v410_v5  ;;  %v414_v11 = vld [vmem:[#allocation10 + $0x18] sm:$0xff]   ;;  %v415_v12 = vld [vmem:[#allocation10 + $0x10] sm:$0xff]   ;;  %v416_v13 = vld [vmem:[#allocation10 + $0x8] sm:$0xff]   ;;  %p523_p12 = scmp.lt.s32.totalorder %s329_s28, %s329_s28 }
  0x40   :  { %372 = vmatprep.subr.bf16.mxu1 %v553_v0  ;;  %380 = vmatprep.subr.bf16.mxu0 %v553_v0  ;;  %v417_v14 = vld [vmem:[#allocation10] sm:$0xff]  }
  0x41   :  { %v343_v20 = vld [vmem:[%s636_s4] ss:$0 sm:$0xff]  ;;  %s518_s4 = scalar_lea.vmem %s329_s28, 128 }
  0x42   :  { %369 = vmatmul.mubr.msk.bf16.vlgmr.msra.gmra.mxu1 %vm106_vm1, %v97_v3  ;;  %v344_v28 = vld [vmem:[%s638_s6] ss:$0 sm:$0xff]  ;;  %p519_p11 = scmp.ne.s32.totalorder %s329_s28, %s518_s4  ;;  %p524_p13 = scmp.lt.s32.totalorder %s518_s4, %s518_s4 }
  0x43   :  { %373 = vmatpush3.bf16.msra.mxu1 %v409_v4  ;;  %374 = vmatprep.mubr.msk.bf16.mxu1 %vm554_vm0, %v553_v0 }
  0x44   :  { %381 = vmatpush3.bf16.msra.mxu0 %v411_v6  ;;  %p525_p0 = por %p524_p13, %p523_p12 }
  0x45   :  { %382 = vmatprep.subr.bf16.mxu0 %v553_v0 }
  0x46   :  { %p526_p1 = pnand %p525_p0, %p519_p11 }
  0x48   :  { %383 = vmatpush3.bf16.msra.mxu0 %v412_v9 }
  0x49   :  { %384 = vmatprep.subr.bf16.mxu0 %v553_v0 }
  0x4a   :  { %375 = vmatmul.mubr.msk.bf16.vlgmr.msra.gmra.mxu1 %vm106_vm1, %v93_v8 }
  0x4c   :  { %385 = vmatpush3.bf16.msra.mxu0 %v413_v10 }
  0x4d   :  { %386 = vmatprep.subr.bf16.mxu0 %v553_v0 }
  0x50   :  { %387 = vmatpush3.bf16.msra.mxu0 %v414_v11 }
  0x51   :  { %388 = vmatprep.subr.bf16.mxu0 %v553_v0 }
  0x54   :  { %389 = vmatpush3.bf16.msra.mxu0 %v415_v12 }
  0x55   :  { %390 = vmatprep.subr.bf16.mxu0 %v553_v0 }
  0x58   :  { %391 = vmatpush3.bf16.msra.mxu0 %v416_v13 }
  0x59   :  { %392 = vmatprep.subr.bf16.mxu0 %v553_v0 }
  0x5c   :  { %393 = vmatpush3.bf16.msra.mxu0 %v417_v14 }
 0x102   :  { %v144_v15 = vpop.f32.mrf.mxu1 }
 0x104   :  { %v370_v16 = vpop.f32.mrf.mxu1 }
 0x106   :  { %v147_v17 = vpop.f32.mrf.mxu1 }
 0x108   :  { %v371_v18 = vpop.f32.mrf.mxu1 }
 0x10a   :  { %v193_v19 = vpop.f32.mrf.mxu1 }
 0x10b   :  { %v194_v21 = vadd.f32 %v193_v19, %v144_v15 }
 0x10c   :  { %v376_v22 = vpop.f32.mrf.mxu1 }
 0x10d   :  { %v206_v23 = vadd.f32 %v343_v20, %v194_v21 }
 0x10e   :  { %v196_v24 = vpop.f32.mrf.mxu1 }
 0x10f   :  { %v207_v25 = vmax.f32 %v206_v23, 0.0 }
 0x110   :  { %v377_v26 = vpop.f32.mrf.mxu1 }
 0x111   :  { %v208_v27 = vpack.c.bf16 %v207_v25, %v207_v25 }
 0x113   :  { %395 = vmatmul.mubr.bf16.vlgmr.msra.gmra.mxu0 %v208_v27 }
 0x1d3   :  { %v314_v29 = vpop.f32.mrf.mxu0 }
 0x1d4   :  { %v315_v30 = vadd.f32 %v344_v28, %v314_v29 }
 0x1d5   :  { %v396_v31 = vpop.f32.mrf.mxu0 }
 0x1d6   :  { %321 = vst.msk [vmem:[#allocation11] sm:$0xff] %vm320_vm2, %v315_v30 }
 0x1d7   :  { %v317_v32 = vpop.f32.mrf.mxu0 }
 0x1d8   :  { %529 = shalt.err (!%p526_p1)
}
 0x1d9   :  { %331 = dma.vmem_to_hbm [thread:$0]  %s329_s28, 128, %s639_s7, [#allocation4]   ;;  %v397_v33 = vpop.f32.mrf.mxu0 }
 0x1da   :  { %544 = dma.done.wait [#allocation4], 128  }
 0x1db   :  { %545 = vsyncadd [#allocation4], 4294967168 }
 0x1dc   :  { %335 = vsyncpa [#allocation3], 1 }
 0x1dd   :  { %336 = vsyncpa [#allocation6], 1 }
 0x1de   :  { %337 = vsyncpa [#allocation9], 1 }
 0x1df   :  { %338 = vsyncpa [#allocation4], 1 }

</bundles_post_ra>
